<compile_context>
chip_gen: v7x
topology: tpu7x:2x2x1
jax: 0.10.0
libtpu: 0.0.40
codegen_flags: <defaults>
</compile_context>

<pallas_src>
import functools
import math

import jax
import jax.numpy as jnp
from jax import lax
from jax.experimental import pallas as pl
from jax.experimental.pallas import tpu as pltpu


def _pick_tile(dim, preferred):
    """Largest preferred tile that evenly divides `dim`, else the full dim."""
    for t in preferred:
        if dim % t == 0:
            return t
    return dim


@functools.lru_cache(maxsize=1)
def _vmem_limit_bytes():
    """Scoped-VMEM limit derived from the chip (v5e/v6e: 128 MiB, v7x: 64 MiB)."""
    cap = 128 * 1024 * 1024
    try:
        cap = int(getattr(pltpu.get_tpu_info(), "vmem_capacity_bytes", cap))
    except Exception:  # non-TPU tracing / interpret mode
        pass
    # Leave headroom below physical capacity, but raise well above the scoped
    # default on 128 MiB chips so bigger tiles pipeline deeply.
    return max(32 * 1024 * 1024, min((cap * 3) // 4, 96 * 1024 * 1024))


# ----------------------------------------------------------------------------
# Tiled linear kernel:  o = x @ w + b   (f32 accumulation on the MXU)
# ----------------------------------------------------------------------------
def _linear_kernel(x_ref, w_ref, b_ref, o_ref, acc_ref, *, compute_dtype):
    k_i = pl.program_id(2)

    @pl.when(k_i == 0)
    def _init():
        acc_ref[...] = jnp.zeros_like(acc_ref)

    acc_ref[...] += jnp.dot(
        x_ref[...].astype(compute_dtype),
        w_ref[...].astype(compute_dtype),
        preferred_element_type=jnp.float32,
    )

    @pl.when(k_i == pl.num_programs(2) - 1)
    def _finalize():
        o_ref[...] = (acc_ref[...] + b_ref[...].astype(jnp.float32)).astype(o_ref.dtype)


def pallas_linear(x2d, w, b, *, out_dtype=None, compute_dtype=jnp.float32):
    """x2d: (M, K), w: (K, N), b: (N,)  ->  (M, N) in out_dtype."""
    M, K = x2d.shape
    K2, N = w.shape
    assert K == K2
    out_dtype = x2d.dtype if out_dtype is None else out_dtype

    # Sublane-dim tiles: multiples of 8 (or full dim).  Lane-dim tiles:
    # multiples of 128 (or full dim).
    tm = _pick_tile(M, (512, 256, 128, 64, 32, 16, 8))
    tn = _pick_tile(N, (512, 256, 128))
    tk = _pick_tile(K, (512, 256, 128))
    grid = (M // tm, N // tn, K // tk)

    x_item = jnp.dtype(x2d.dtype).itemsize
    w_item = jnp.dtype(w.dtype).itemsize
    o_item = jnp.dtype(out_dtype).itemsize
    # Account for block revisits: x is re-read once per N tile, w once per M tile.
    bytes_accessed = (M * K * x_item * (N // tn)
                      + K * N * w_item * (M // tm)
                      + M * N * o_item
                      + N * 4 * (M // tm))

    kernel = functools.partial(_linear_kernel, compute_dtype=compute_dtype)
    return pl.pallas_call(
        kernel,
        out_shape=jax.ShapeDtypeStruct((M, N), out_dtype),
        grid=grid,
        in_specs=[
            pl.BlockSpec((tm, tk), lambda i, j, k: (i, k)),
            pl.BlockSpec((tk, tn), lambda i, j, k: (k, j)),
            pl.BlockSpec((1, tn), lambda i, j, k: (0, j)),
        ],
        out_specs=pl.BlockSpec((tm, tn), lambda i, j, k: (i, j)),
        scratch_shapes=[pltpu.VMEM((tm, tn), jnp.float32)],
        compiler_params=pltpu.CompilerParams(
            dimension_semantics=("parallel", "parallel", "arbitrary"),
            vmem_limit_bytes=_vmem_limit_bytes(),
        ),
        cost_estimate=pl.CostEstimate(
            flops=2 * M * N * K,
            transcendentals=0,
            bytes_accessed=bytes_accessed,
        ),
    )(x2d, w, b.reshape(1, N).astype(jnp.float32))


# ----------------------------------------------------------------------------
# Flash-style multi-head attention (heads folded in HBM, batched in-kernel).
# Grid = (B, S//tq, S//tkv); KV axis last ("arbitrary") with online softmax.
# ----------------------------------------------------------------------------
@functools.lru_cache(maxsize=None)
def _batched_heads_supported(compute_dtype):
    """Probe: can this Mosaic build lower the head-batched attention body
    (dot_general with a non-leading batch dim + minor-dim concatenate)?"""
    def probe(q_ref, k_ref, o_ref):
        q = q_ref[...]                       # (m, H, d)
        k = k_ref[...]                       # (n, H, d)
        s = lax.dot_general(q, k, (((2,), (2,)), ((1,), (1,))),
                            preferred_element_type=jnp.float32)   # (H, m, n)
        p = (s - jnp.max(s, axis=-1, keepdims=True)).astype(q.dtype)
        pv = lax.dot_general(p, k, (((2,), (0,)), ((0,), (1,))),
                             preferred_element_type=jnp.float32)  # (H, m, d)
        o_ref[...] = jnp.concatenate(
            [pv[h] for h in range(pv.shape[0])], axis=-1)

    try:
        x = jnp.zeros((16, 2, 128), compute_dtype)
        out = pl.pallas_call(
            probe,
            out_shape=jax.ShapeDtypeStruct((16, 256), jnp.float32),
        )(x, x)
        jax.block_until_ready(out)
        return True
    except Exception:
        return False


def _attention_tiles(S, heads, d_head, in_dtype, out_dtype):
    """Pick (tq, tkv) and shrink them if the estimated VMEM footprint is large
    for this chip (mostly matters on v7x's 64 MiB)."""
    D = heads * d_head
    tq = _pick_tile(S, (256, 128, 64, 32, 16, 8))
    tkv = _pick_tile(S, (512, 256, 128))
    vmem = _vmem_limit_bytes()
    in_item = jnp.dtype(in_dtype).itemsize
    out_item = jnp.dtype(out_dtype).itemsize
    pad_h = 8 * ((heads + 7) // 8)
    pad_dh = 128 * ((d_head + 127) // 128)

    def footprint(tq_, tkv_):
        blocks = 2 * (tq_ + 2 * tkv_) * pad_h * pad_dh * in_item   # dbl-buffered q/k/v
        out = 2 * tq_ * max(D, 128) * out_item                      # dbl-buffered out
        scratch = tq_ * heads * (pad_dh + 2 * 128) * 4              # acc + m + l (f32)
        temps = 2 * heads * tq_ * tkv_ * 4                          # f32 scores/probs
        return blocks + out + scratch + temps

    def can_halve(t, unit):
        return t % 2 == 0 and (t // 2) % unit == 0 and S % (t // 2) == 0

    while footprint(tq, tkv) > vmem // 2 and can_halve(tkv, 128):
        tkv //= 2
    while footprint(tq, tkv) > vmem // 2 and can_halve(tq, 8):
        tq //= 2
    return tq, tkv


def _attention_kernel_batched(q_ref, k_ref, v_ref, o_ref, acc_ref, m_ref, l_ref,
                              *, compute_dtype):
    """All heads in one contraction per KV tile; online softmax in f32."""
    kv_i = pl.program_id(2)

    @pl.when(kv_i == 0)
    def _init():
        m_ref[...] = jnp.full_like(m_ref, -jnp.inf)
        l_ref[...] = jnp.zeros_like(l_ref)
        acc_ref[...] = jnp.zeros_like(acc_ref)

    q = q_ref[0].astype(compute_dtype)   # (tq,  H, dh); 1/sqrt(dh) folded into q_w
    k = k_ref[0].astype(compute_dtype)   # (tkv, H, dh)
    v = v_ref[0].astype(compute_dtype)   # (tkv, H, dh)

    # s[h,i,j] = sum_d q[i,h,d] * k[j,h,d]  -- one MXU call batched over heads.
    s = lax.dot_general(q, k, (((2,), (2,)), ((1,), (1,))),
                        preferred_element_type=jnp.float32)         # (H, tq, tkv)

    m_prev = m_ref[...]                                              # (H, tq, 1)
    m_new = jnp.maximum(m_prev, jnp.max(s, axis=-1, keepdims=True))
    alpha = jnp.exp(m_prev - m_new)                                  # f32 softmax math
    p = jnp.exp(s - m_new)
    l_ref[...] = alpha * l_ref[...] + jnp.sum(p, axis=-1, keepdims=True)

    # pv[h,i,d] = sum_j p[h,i,j] * v[j,h,d]
    pv = lax.dot_general(p.astype(compute_dtype), v,
                         (((2,), (0,)), ((0,), (1,))),
                         preferred_element_type=jnp.float32)         # (H, tq, dh)
    acc_ref[...] = alpha * acc_ref[...] + pv
    m_ref[...] = m_new

    @pl.when(kv_i == pl.num_programs(2) - 1)
    def _finalize():
        approx = jnp.dtype(compute_dtype) != jnp.dtype(jnp.float32)
        out = acc_ref[...] * pl.reciprocal(l_ref[...], approx=approx)  # (H, tq, dh)
        # Stitch head slabs along the lane dim once per output block and issue a
        # single lane-dense (tq, D) store (no per-head masked column stores).
        o_ref[0] = jnp.concatenate(
            [out[h] for h in range(out.shape[0])], axis=-1).astype(o_ref.dtype)


def _attention_kernel_unrolled(q_ref, k_ref, v_ref, o_ref, acc_ref, m_ref, l_ref,
                               *, heads, d_head, compute_dtype):
    """Fallback (previously validated): per-head 2-D dots on (tq, D) blocks."""
    kv_i = pl.program_id(2)

    @pl.when(kv_i == 0)
    def _init():
        m_ref[...] = jnp.full_like(m_ref, -jnp.inf)
        l_ref[...] = jnp.zeros_like(l_ref)
        acc_ref[...] = jnp.zeros_like(acc_ref)

    q = q_ref[0].astype(compute_dtype)   # (tq, D); scale folded into q_w
    k = k_ref[0].astype(compute_dtype)   # (tkv, D)
    v = v_ref[0].astype(compute_dtype)   # (tkv, D)

    for h in range(heads):
        sl = slice(h * d_head, (h + 1) * d_head)
        qh, kh, vh = q[:, sl], k[:, sl], v[:, sl]
        s = lax.dot_general(qh, kh, (((1,), (1,)), ((), ())),
                            preferred_element_type=jnp.float32)      # (tq, tkv)
        m_prev = m_ref[h]
        m_new = jnp.maximum(m_prev, jnp.max(s, axis=-1, keepdims=True))
        alpha = jnp.exp(m_prev - m_new)
        p = jnp.exp(s - m_new)
        l_ref[h] = alpha * l_ref[h] + jnp.sum(p, axis=-1, keepdims=True)
        acc_ref[h] = alpha * acc_ref[h] + jnp.dot(
            p.astype(compute_dtype), vh, preferred_element_type=jnp.float32)
        m_ref[h] = m_new

    @pl.when(kv_i == pl.num_programs(2) - 1)
    def _finalize():
        approx = jnp.dtype(compute_dtype) != jnp.dtype(jnp.float32)
        for h in range(heads):
            inv = pl.reciprocal(l_ref[h], approx=approx)
            o_ref[0, :, h * d_head:(h + 1) * d_head] = (
                acc_ref[h] * inv).astype(o_ref.dtype)


def pallas_attention(q_p, k_p, v_p, heads, d_head, *, out_dtype, compute_dtype):
    """q_p/k_p/v_p: (B, S, D) projections (scale already folded into q) -> (B, S, D)."""
    B, S, D = q_p.shape
    tq, tkv = _attention_tiles(S, heads, d_head, q_p.dtype, out_dtype)
    grid = (B, S // tq, S // tkv)
    batched = _batched_heads_supported(jnp.dtype(compute_dtype))

    if batched:
        kernel = functools.partial(_attention_kernel_batched,
                                   compute_dtype=compute_dtype)
        # Free minor-dim split in HBM; the DMA lands (tq, H, dh) blocks in VMEM,
        # so the kernel needs no per-head slicing or reshapes.
        q_in = q_p.reshape(B, S, heads, d_head)
        k_in = k_p.reshape(B, S, heads, d_head)
        v_in = v_p.reshape(B, S, heads, d_head)
        q_spec = pl.BlockSpec((1, tq, heads, d_head), lambda b, qi, ki: (b, qi, 0, 0))
        kv_spec = pl.BlockSpec((1, tkv, heads, d_head), lambda b, qi, ki: (b, ki, 0, 0))
    else:
        # Fallback for Mosaic builds that can't lower a non-leading batch dim in
        # dot_general: lane-dense (tq, D) blocks + per-head 2-D dots.
        kernel = functools.partial(_attention_kernel_unrolled, heads=heads,
                                   d_head=d_head, compute_dtype=compute_dtype)
        q_in, k_in, v_in = q_p, k_p, v_p
        q_spec = pl.BlockSpec((1, tq, D), lambda b, qi, ki: (b, qi, 0))
        kv_spec = pl.BlockSpec((1, tkv, D), lambda b, qi, ki: (b, ki, 0))

    in_item = jnp.dtype(q_p.dtype).itemsize
    out_item = jnp.dtype(out_dtype).itemsize
    bytes_accessed = (B * S * D * in_item                      # q
                      + 2 * B * S * D * in_item * (S // tq)    # k, v re-read per q tile
                      + B * S * D * out_item)                  # out
    return pl.pallas_call(
        kernel,
        out_shape=jax.ShapeDtypeStruct((B, S, D), out_dtype),
        grid=grid,
        in_specs=[q_spec, kv_spec, kv_spec],
        out_specs=pl.BlockSpec((1, tq, D), lambda b, qi, ki: (b, qi, 0)),
        scratch_shapes=[
            pltpu.VMEM((heads, tq, d_head), jnp.float32),   # acc
            pltpu.VMEM((heads, tq, 1), jnp.float32),        # running max m
            pltpu.VMEM((heads, tq, 1), jnp.float32),        # running sum l
        ],
        compiler_params=pltpu.CompilerParams(
            dimension_semantics=("parallel", "parallel", "arbitrary"),
            vmem_limit_bytes=_vmem_limit_bytes(),
        ),
        cost_estimate=pl.CostEstimate(
            flops=4 * B * heads * S * S * d_head,
            transcendentals=B * heads * S * S,
            bytes_accessed=bytes_accessed,
        ),
    )(q_in, k_in, v_in)


# ----------------------------------------------------------------------------
# Module wrapper
# ----------------------------------------------------------------------------
class MultiHeadAttentionPallas:
    def __init__(self, heads, d_model, key, dropout=0.1,
                 compute_dtype=jnp.bfloat16):
        assert d_model % heads == 0
        self.heads = heads
        self.d_model = d_model
        self.d_head = d_model // heads
        # Default bf16: MXU fast path + bf16 HBM intermediates (f32 accumulation
        # and f32 softmax math are kept).  Pass jnp.float32 for the strict path.
        self.compute_dtype = jnp.dtype(compute_dtype)
        scale = 1.0 / math.sqrt(float(self.d_head))

        # Deterministic init (mimics nn.Linear uniform bounds). Weights are
        # stored as (d_in, d_out) so they are applied as x @ w + b.
        def init_linear(kk):
            kw, kb = jax.random.split(kk)
            bound = 1.0 / math.sqrt(d_model)
            w = jax.random.uniform(kw, (d_model, d_model), jnp.float32, -bound, bound)
            b = jax.random.uniform(kb, (d_model,), jnp.float32, -bound, bound)
            return w, b

        k1, k2, k3, k4 = jax.random.split(key, 4)
        # f32 master parameters (also used by the pure-JAX reference check).
        self.q_w, self.q_b = init_linear(k1)
        self.k_w, self.k_b = init_linear(k2)
        self.v_w, self.v_b = init_linear(k3)  # defined but unused (reference quirk)
        self.o_w, self.o_b = init_linear(k4)

        # Kernel-side parameter copies, prepared once at init:
        #  * 1/sqrt(d_head) folded into the Q projection (no in-kernel scale mul),
        #  * fused [Q|K] weights for the self-attention fast path (no per-call concat),
        #  * weights pre-cast to compute_dtype (halves weight DMA on the bf16 path);
        #    biases stay f32 (added to the f32 accumulator).
        wd = self.compute_dtype
        self._qs_w = (self.q_w * scale).astype(wd)
        self._qs_b = self.q_b * scale
        self._k_w = self.k_w.astype(wd)
        self._o_w = self.o_w.astype(wd)
        self._qk_w = jnp.concatenate([self.q_w * scale, self.k_w], axis=1).astype(wd)
        self._qk_b = jnp.concatenate([self.q_b * scale, self.k_b], axis=0)

    def __call__(self, q, k, v, mask=None):
        # TODO(synk): mask handling is dead code in the reference forward (mask
        # lands in the unused d_k argument), so it is intentionally omitted.
        B, S, D = q.shape
        M = B * S
        cd = self.compute_dtype
        act_dtype = cd   # HBM dtype of intermediates (bf16 on the fast path)

        if (q is k) and (k is v):
            # Self-attention fast path: one fused GEMM produces the Q and K
            # projections; V projection == K projection here because the
            # reference uses k_linear for V and the inputs coincide.
            qk = pallas_linear(q.reshape(M, D), self._qk_w, self._qk_b,
                               out_dtype=act_dtype, compute_dtype=cd)
            q_p, k_p = qk[:, :D], qk[:, D:]
            v_p = k_p
        else:
            q_p = pallas_linear(q.reshape(M, D), self._qs_w, self._qs_b,
                                out_dtype=act_dtype, compute_dtype=cd)
            k_p = pallas_linear(k.reshape(M, D), self._k_w, self.k_b,
                                out_dtype=act_dtype, compute_dtype=cd)
            # V intentionally uses k_linear's weights (reference-module quirk).
            v_p = pallas_linear(v.reshape(M, D), self._k_w, self.k_b,
                                out_dtype=act_dtype, compute_dtype=cd)

        # Heads stay folded in HBM; the attention kernel batches them in-kernel
        # and writes the (B, S, D) output lane-dense directly.
        attn = pallas_attention(
            q_p.reshape(B, S, D), k_p.reshape(B, S, D), v_p.reshape(B, S, D),
            self.heads, self.d_head, out_dtype=act_dtype, compute_dtype=cd)

        out = pallas_linear(attn.reshape(M, D), self._o_w, self.o_b,
                            out_dtype=q.dtype, compute_dtype=cd)
        return out.reshape(B, S, D)


# ----------------------------------------------------------------------------
# Pure-JAX reference (same semantics, f32) for a correctness check.
# ----------------------------------------------------------------------------
def reference_forward(mha, q, k, v):
    B, S, D = q.shape
    H, Dh = mha.heads, mha.d_head
    q_p = q @ mha.q_w + mha.q_b
    k_p = k @ mha.k_w + mha.k_b
    v_p = v @ mha.k_w + mha.k_b          # reference quirk reproduced: k_linear on v
    qh = q_p.reshape(B, S, H, Dh).transpose(0, 2, 1, 3)
    kh = k_p.reshape(B, S, H, Dh).transpose(0, 2, 1, 3)
    vh = v_p.reshape(B, S, H, Dh).transpose(0, 2, 1, 3)
    scores = jnp.einsum("bhqd,bhkd->bhqk", qh, kh) / math.sqrt(Dh)
    probs = jax.nn.softmax(scores, axis=-1)
    attn = jnp.einsum("bhqk,bhkd->bhqd", probs, vh)
    concat = attn.transpose(0, 2, 1, 3).reshape(B, S, D)
    return concat @ mha.o_w + mha.o_b


if __name__ == "__main__":
    B, S, D, H = 2, 8, 32, 4

    key = jax.random.PRNGKey(0)
    kq, kk, kv, kparams = jax.random.split(key, 4)
    q = jax.random.normal(kq, (B, S, D), jnp.float32)
    k = jax.random.normal(kk, (B, S, D), jnp.float32)
    v = jax.random.normal(kv, (B, S, D), jnp.float32)

    # Strict-check path: f32 operands / intermediates end to end.
    mha_f32 = MultiHeadAttentionPallas(heads=H, d_model=D, key=kparams,
                                       compute_dtype=jnp.float32)
    out = jax.block_until_ready(mha_f32(q, k, v))
    ref = reference_forward(mha_f32, q, k, v)
    assert out.shape == (B, S, D)
    assert jnp.allclose(out, ref, atol=1e-4, rtol=1e-4), "f32 cross-attn mismatch"

    # Exercise the fused-[Q|K] self-attention fast path as well.
    out_self = jax.block_until_ready(mha_f32(q, q, q))
    ref_self = reference_forward(mha_f32, q, q, q)
    assert jnp.allclose(out_self, ref_self, atol=1e-4, rtol=1e-4), \
        "f32 self-attn mismatch"

    # Default fast path: bf16 MXU operands, bf16 intermediates/weights in HBM,
    # f32 accumulation and f32 softmax math.  Loose tolerance (smoke check).
    mha_bf16 = MultiHeadAttentionPallas(heads=H, d_model=D, key=kparams)
    out_bf16 = jax.block_until_ready(mha_bf16(q, k, v))
    assert out_bf16.dtype == q.dtype
    assert jnp.allclose(out_bf16, ref, atol=1e-1, rtol=1e-1), "bf16 path mismatch"

    print("KERNEL_OK")
</pallas_src>

<mosaic_0001>
module attributes {stable_mosaic.version = 11 : i64} {
  func.func @_linear_kernel(%arg0: i32, %arg1: i32, %arg2: i32, %arg3: memref<16x32xf32, #tpu.memory_space<vmem>>, %arg4: memref<32x32xf32, #tpu.memory_space<vmem>>, %arg5: memref<1x32xf32, #tpu.memory_space<vmem>>, %arg6: memref<16x32xf32, #tpu.memory_space<vmem>>, %arg7: memref<16x32xf32, #tpu.memory_space<vmem>>) attributes {dimension_semantics = [#tpu.dimension_semantics<parallel>, #tpu.dimension_semantics<parallel>, #tpu.dimension_semantics<arbitrary>], iteration_bounds = array<i64: 1, 1, 1>, scalar_prefetch = 0 : i64, scratch_operands = 1 : i64, tpu.core_type = #tpu.core_type<tc>, window_params = [{transform_indices = @transform_0, window_bounds = array<i64: 16, 32>}, {transform_indices = @transform_1, window_bounds = array<i64: 32, 32>}, {transform_indices = @transform_2, window_bounds = array<i64: 1, 32>}, {transform_indices = @transform_3, window_bounds = array<i64: 16, 32>}]} {
    %c0_i32 = arith.constant 0 : i32
    %0 = arith.cmpi eq, %arg2, %c0_i32 : i32
    %1 = arith.extui %0 : i1 to i32
    %c0_i32_0 = arith.constant 0 : i32
    %2 = arith.cmpi ne, %1, %c0_i32_0 : i32
    scf.if %2 {
      %cst_10 = arith.constant 0.000000e+00 : f32
      %12 = vector.broadcast %cst_10 : f32 to vector<16x32xf32>
      %c0_11 = arith.constant 0 : index
      %c0_12 = arith.constant 0 : index
      %13 = vector.load %arg7[%c0_11, %c0_12] : memref<16x32xf32, #tpu.memory_space<vmem>>, vector<16x32xf32>
      tpu.vector_store %arg7[%c0_11, %c0_12], %12 {strides = array<i32>} : memref<16x32xf32, #tpu.memory_space<vmem>>, vector<16x32xf32>,
    } else {
    }
    %c0 = arith.constant 0 : index
    %c0_1 = arith.constant 0 : index
    %3 = vector.load %arg7[%c0, %c0_1] : memref<16x32xf32, #tpu.memory_space<vmem>>, vector<16x32xf32>
    %c0_2 = arith.constant 0 : index
    %c0_3 = arith.constant 0 : index
    %4 = vector.load %arg3[%c0_2, %c0_3] : memref<16x32xf32, #tpu.memory_space<vmem>>, vector<16x32xf32>
    %c0_4 = arith.constant 0 : index
    %c0_5 = arith.constant 0 : index
    %5 = vector.load %arg4[%c0_4, %c0_5] : memref<32x32xf32, #tpu.memory_space<vmem>>, vector<32x32xf32>
    %cst = arith.constant dense<0.000000e+00> : vector<16x32xf32>
    %6 = tpu.matmul %4, %5, %cst {dimension_numbers = #tpu.dot_dimension_numbers<[1], [0], [0], [1], [0, 0, 1, 1], [], []>} : vector<16x32xf32>, vector<32x32xf32>, vector<16x32xf32> -> vector<16x32xf32>
    %7 = arith.addf %3, %6 : vector<16x32xf32>
    %c0_6 = arith.constant 0 : index
    %c0_7 = arith.constant 0 : index
    %8 = vector.load %arg7[%c0_6, %c0_7] : memref<16x32xf32, #tpu.memory_space<vmem>>, vector<16x32xf32>
    tpu.vector_store %arg7[%c0_6, %c0_7], %7 {strides = array<i32>} : memref<16x32xf32, #tpu.memory_space<vmem>>, vector<16x32xf32>,
    %c0_i32_8 = arith.constant 0 : i32
    %9 = arith.cmpi eq, %arg2, %c0_i32_8 : i32
    %10 = arith.extui %9 : i1 to i32
    %c0_i32_9 = arith.constant 0 : i32
    %11 = arith.cmpi ne, %10, %c0_i32_9 : i32
    scf.if %11 {
      %c0_10 = arith.constant 0 : index
      %c0_11 = arith.constant 0 : index
      %12 = vector.load %arg7[%c0_10, %c0_11] : memref<16x32xf32, #tpu.memory_space<vmem>>, vector<16x32xf32>
      %c0_12 = arith.constant 0 : index
      %c0_13 = arith.constant 0 : index
      %13 = vector.load %arg5[%c0_12, %c0_13] : memref<1x32xf32, #tpu.memory_space<vmem>>, vector<1x32xf32>
      %14 = vector.broadcast %13 : vector<1x32xf32> to vector<16x32xf32>
      %15 = arith.addf %12, %14 : vector<16x32xf32>
      %c0_14 = arith.constant 0 : index
      %c0_15 = arith.constant 0 : index
      %16 = vector.load %arg6[%c0_14, %c0_15] : memref<16x32xf32, #tpu.memory_space<vmem>>, vector<16x32xf32>
      tpu.vector_store %arg6[%c0_14, %c0_15], %15 {strides = array<i32>} : memref<16x32xf32, #tpu.memory_space<vmem>>, vector<16x32xf32>,
    } else {
    }
    return
  }
  func.func @transform_0(%arg0: i32, %arg1: i32, %arg2: i32) -> (i32, i32) {
    %c0_i32 = arith.constant 0 : i32
    return %arg0, %arg2 : i32, i32
  }
  func.func @transform_1(%arg0: i32, %arg1: i32, %arg2: i32) -> (i32, i32) {
    %c0_i32 = arith.constant 0 : i32
    return %arg2, %arg1 : i32, i32
  }
  func.func @transform_2(%arg0: i32, %arg1: i32, %arg2: i32) -> (i32, i32) {
    %c0_i32 = arith.constant 0 : i32
    %c0_i32_0 = arith.constant 0 : i32
    return %c0_i32, %arg1 : i32, i32
  }
  func.func @transform_3(%arg0: i32, %arg1: i32, %arg2: i32) -> (i32, i32) {
    %c0_i32 = arith.constant 0 : i32
    return %arg0, %arg1 : i32, i32
  }
}

</mosaic_0001>

<bundles_post_ra>
// kernel: tpu_custom_call.1
= control target key start
LH: loop header
LB: loop body
LE: loop exit
PB: predicated region body
PF: predicated region fallthrough
CT: control target
= control target key end

     0   :  { %8 = vsyncpa [#allocation4], 0  ;;  %s417_s0 = inlined_call_operand.hbm [shape: f32[16,32], index: 0, kind: input, shape index: {}]   ;;  %s418_s1 = inlined_call_operand.hbm [shape: f32[32,32], index: 1, kind: input, shape index: {}]   ;;  %s419_s2 = inlined_call_operand.hbm [shape: f32[1,32], index: 2, kind: input, shape index: {}]   ;;  %s420_s3 = inlined_call_operand.hbm [shape: f32[16,32], index: 3, kind: output, shape index: {}]  }
   0x1   :  { %9 = vsyncpa [#allocation7], 0 }
   0x2   :  { %10 = vsyncpa [#allocation5], 0  ;;  %s318_s12 = smov [#allocation6]   ;;  %s319_s14 = smov [#allocation3]  }
   0x3   :  { %s28_s13 = sshll.u32 %s318_s12, 4  ;;  %s16_s15 = sshll.u32 %s319_s14, 4  ;;  %s29_s13 = int_to_ptr.vmem [resolvable:$true] %s28_s13  ;;  %s345_s15 = int_to_ptr.vmem [resolvable:$true] %s16_s15 }
   0x4   :  { %s224_s18 = scalar_lea.hbm %s418_s1, 512 }
   0x5   :  { %p225_p0 = scmp.ne.s32.totalorder %s418_s1, %s224_s18  ;;  %p228_p1 = scmp.lt.u32.totalorder %s224_s18, %s418_s1 }
   0x7   :  { %p230_p2 = pnand %p228_p1, %p225_p0 }
   0x9   :  { %233 = shalt.err (!%p230_p2)
}
   0xa   :  { %s234_s23 = scalar_lea.vmem %s29_s13, 512  ;;  %p239_p4 = scmp.lt.s32.totalorder %s29_s13, %s29_s13 }
   0xb   :  { %p235_p3 = scmp.ne.s32.totalorder %s29_s13, %s234_s23  ;;  %p240_p5 = scmp.lt.s32.totalorder %s234_s23, %s234_s23 }
   0xd   :  { %p241_p6 = por %p240_p5, %p239_p4 }
   0xf   :  { %p242_p7 = pnand %p241_p6, %p235_p3 }
  0x11   :  { %245 = shalt.err (!%p242_p7)
}
  0x12   :  { %s320_s24 = smov 128   ;;  %s321_s25 = smov 8  }
  0x13   :  { %34 = dma.hbm_to_vmem [thread:$0]  %s418_s1, 512, %s29_s13, [#allocation7], %s320_s24, %s320_s24, %s321_s25  }
  0x14   :  { %s246_s30 = scalar_lea.hbm %s417_s0, 256 }
  0x15   :  { %p247_p8 = scmp.ne.s32.totalorder %s417_s0, %s246_s30  ;;  %p250_p9 = scmp.lt.u32.totalorder %s246_s30, %s417_s0 }
  0x17   :  { %p252_p10 = pnand %p250_p9, %p247_p8 }
  0x19   :  { %255 = shalt.err (!%p252_p10)
}
  0x1a   :  { %s256_s8 = scalar_lea.vmem %s345_s15, 256  ;;  %p261_p12 = scmp.lt.s32.totalorder %s345_s15, %s345_s15 }
  0x1b   :  { %p257_p11 = scmp.ne.s32.totalorder %s345_s15, %s256_s8  ;;  %p262_p13 = scmp.lt.s32.totalorder %s256_s8, %s256_s8 }
  0x1d   :  { %p263_p0 = por %p262_p13, %p261_p12 }
  0x1f   :  { %p264_p1 = pnand %p263_p0, %p257_p11 }
  0x21   :  { %267 = shalt.err (!%p264_p1)
}
  0x22   :  { %22 = dma.hbm_to_vmem [thread:$0]  %s417_s0, 256, %s345_s15, [#allocation4], %s320_s24, %s320_s24, %s321_s25  }
  0x23   :  { %s322_s10 = smov [#allocation8]   ;;  %s268_s14 = scalar_lea.hbm %s419_s2, 16 }
  0x24   :  { %s41_s11 = sshll.u32 %s322_s10, 4  ;;  %p269_p2 = scmp.ne.s32.totalorder %s419_s2, %s268_s14  ;;  %s42_s11 = int_to_ptr.vmem [resolvable:$true] %s41_s11 }
  0x25   :  { %p272_p3 = scmp.lt.u32.totalorder %s268_s14, %s419_s2 }
  0x27   :  { %p274_p4 = pnand %p272_p3, %p269_p2 }
  0x29   :  { %277 = shalt.err (!%p274_p4)
}
  0x2a   :  { %s278_s20 = scalar_lea.vmem %s42_s11, 16  ;;  %s282_s0 = scalar_lea.vmem %s42_s11, 32 }
  0x2b   :  { %p279_p5 = scmp.ne.s32.totalorder %s42_s11, %s278_s20  ;;  %p283_p6 = scmp.lt.s32.totalorder %s42_s11, %s42_s11 }
  0x2c   :  { %p284_p7 = scmp.lt.s32.totalorder %s282_s0, %s278_s20 }
  0x2e   :  { %p285_p8 = por %p284_p7, %p283_p6 }
  0x30   :  { %p286_p9 = pnand %p285_p8, %p279_p5 }
  0x32   :  { %289 = shalt.err (!%p286_p9)
}
  0x33   :  { %44 = dma.hbm_to_vmem [thread:$0]  %s419_s2, 16, %s42_s11, [#allocation7]  }
  0x34   :  { %312 = dma.done.wait [#allocation4], 256  }
  0x35   :  { %313 = vsyncadd [#allocation4], 4294967040 }
  0x36   :  { %314 = dma.done.wait [#allocation7], 528  }
  0x37   :  { %315 = vsyncadd [#allocation7], 4294966768  ;;  %vm58_vm0 = vcmask 261120   ;;  %v323_v0 = vmov 0.0   ;;  %v65_v1 = vld [vmem:[#allocation6] sm:$0xff]  ;;  %v66_v2 = vld [vmem:[#allocation6 + $0x8] sm:$0xff] }
  0x38   :  { %60 = vst.msk [vmem:[#allocation2 + $0x8] sm:$0xff] %vm58_vm0, %v323_v0  ;;  %59 = vst.msk [vmem:[#allocation2] sm:$0xff] %vm58_vm0, %v323_v0  ;;  %v67_v3 = vld [vmem:[#allocation6 + $0x10] sm:$0xff]  ;;  %v209_v4 = vpack.c.bf16 %v66_v2, %v65_v1  ;;  %v68_v5 = vld [vmem:[#allocation6 + $0x18] sm:$0xff]  ;;  %s324_s2 = smov [#allocation9]  }
  0x39   :  { %v63_v6 = vld [vmem:[#allocation3] sm:$0xff]  ;;  %v213_v7 = vpack.c.bf16 %v68_v5, %v67_v3  ;;  %v64_v8 = vld [vmem:[#allocation3 + $0x8] sm:$0xff]  ;;  %v191_v15 = vld [vmem:[#allocation8] ss:$0 sm:$0xff]  ;;  %s176_s22 = sshll.u32 %s324_s2, 4  ;;  %s177_s22 = int_to_ptr.vmem [resolvable:$true] %s176_s22 }
  0x3a   :  { %206 = vmatprep.mubr.msk.f32.mxu0 %vm58_vm0, %v63_v6  ;;  %210 = vmatprep.subr.bf16.mxu0 %v209_v4  ;;  %s290_s23 = scalar_lea.vmem %s177_s22, 256  ;;  %p295_p11 = scmp.lt.s32.totalorder %s177_s22, %s177_s22 }
  0x3b   :  { %212 = vmatpush3.bf16.msra.mxu0 %v209_v4  ;;  %p291_p10 = scmp.ne.s32.totalorder %s177_s22, %s290_s23  ;;  %p296_p12 = scmp.lt.s32.totalorder %s290_s23, %s290_s23 }
  0x3c   :  { %214 = vmatprep.subr.bf16.mxu0 %v213_v7 }
  0x3d   :  { %p297_p13 = por %p296_p12, %p295_p11 }
  0x3f   :  { %216 = vmatpush3.bf16.msra.mxu0 %v213_v7  ;;  %v62_v9 = vld [vmem:[#allocation2 + $0x8] sm:$0xff]  ;;  %v61_v10 = vld [vmem:[#allocation2] sm:$0xff]  ;;  %p298_p0 = pnand %p297_p13, %p291_p10 }
  0x42   :  { %207 = vmatmul.mubr.msk.f32.vlgmr.msra.gmra.mrb[0].mxu0 %vm58_vm0, %v64_v8 }
 0x115   :  { %v208_v11 = vpop.f32.mrb[0].mxu0 }
 0x116   :  { %v152_v12 = vadd.f32 %v208_v11, %v62_v9  ;;  %v142_v13 = vpop.f32.mrb[1].mxu0 }
 0x117   :  { %v151_v14 = vadd.f32 %v142_v13, %v61_v10 }
 0x118   :  { %154 = vst.msk [vmem:[#allocation2 + $0x8] sm:$0xff] %vm58_vm0, %v152_v12 }
 0x119   :  { %153 = vst.msk [vmem:[#allocation2] sm:$0xff] %vm58_vm0, %v151_v14 }
 0x11f   :  { %v159_v16 = vld [vmem:[#allocation2 + $0x8] sm:$0xff] }
 0x120   :  { %v158_v17 = vld [vmem:[#allocation2] sm:$0xff]  ;;  %v168_v18 = vadd.f32 %v191_v15, %v159_v16 }
 0x121   :  { %v167_v19 = vadd.f32 %v191_v15, %v158_v17 }
 0x122   :  { %170 = vst.msk [vmem:[#allocation9 + $0x8] sm:$0xff] %vm58_vm0, %v168_v18 }
 0x123   :  { %169 = vst.msk [vmem:[#allocation9] sm:$0xff] %vm58_vm0, %v167_v19 }
 0x124   :  { %301 = shalt.err (!%p298_p0)
}
 0x125   :  { %s302_s28 = scalar_lea.hbm %s420_s3, 256 }
 0x126   :  { %p303_p1 = scmp.ne.s32.totalorder %s420_s3, %s302_s28  ;;  %p306_p2 = scmp.lt.u32.totalorder %s302_s28, %s420_s3 }
 0x128   :  { %p308_p3 = pnand %p306_p2, %p303_p1 }
 0x12a   :  { %311 = shalt.err (!%p308_p3)
}
 0x12b   :  { %182 = dma.vmem_to_hbm [thread:$0]  %s177_s22, 256, %s420_s3, [#allocation5], %s320_s24, %s320_s24, %s321_s25  }
 0x12c   :  { %316 = dma.done.wait [#allocation5], 256  }
 0x12d   :  { %317 = vsyncadd [#allocation5], 4294967040 }
 0x12e   :  { %186 = vsyncpa [#allocation4], 1 }
 0x12f   :  { %187 = vsyncpa [#allocation7], 1 }
 0x130   :  { %188 = vsyncpa [#allocation5], 1 }

</bundles_post_ra>
